<compile_context>
chip_gen: v6e
topology: v6e:2x2x1
jax: 0.10.0
libtpu: 0.0.40
codegen_flags: <defaults>
</compile_context>

<pallas_src>
import functools

import numpy as np
import jax
import jax.numpy as jnp
from jax.experimental import pallas as pl
from jax.experimental.pallas import tpu as pltpu


# ----------------------------------------------------------------------------
# small helpers
# ----------------------------------------------------------------------------
def _round_up(x, m):
    return (x + m - 1) // m * m


def _pad2d(a, rows, cols, value=0.0):
    r, c = a.shape
    if r == rows and c == cols:
        return a
    return jnp.pad(a, ((0, rows - r), (0, cols - c)), constant_values=value)


def _apply_act(y, act):
    if act == "relu":
        return jnp.maximum(y, 0.0)
    if act == "tanh":
        return jnp.tanh(y)
    return y


# ----------------------------------------------------------------------------
# fused matmul + bias + activation (tiled, pipelined, bf16 MXU / f32 acc)
# ----------------------------------------------------------------------------
def _matmul_epilogue_kernel(x_ref, w_ref, b_ref, o_ref, acc_ref, *, act):
    @pl.when(pl.program_id(2) == 0)
    def _init():
        acc_ref[...] = jnp.zeros_like(acc_ref)

    acc_ref[...] += jnp.dot(x_ref[...], w_ref[...],
                            preferred_element_type=jnp.float32)

    @pl.when(pl.program_id(2) == pl.num_programs(2) - 1)
    def _finalize():
        y = acc_ref[...] + b_ref[...]            # f32 epilogue
        o_ref[...] = _apply_act(y, act).astype(o_ref.dtype)


def fused_matmul(x, w, b, act=None):
    """y = act(x @ w + b); x:(M,K), w:(K,N), b:(N,) -> (M,N) f32."""
    M, K = x.shape
    K2, N = w.shape
    assert K == K2
    # Tile sizes: lane-dense (x128 on K/N), sublane-aligned M; capped so
    # double-buffered operands stay well under v7x's 64 MiB VMEM.
    tm = min(_round_up(max(M, 1), 16), 512)
    tn = min(_round_up(max(N, 1), 128), 256)
    tk = min(_round_up(max(K, 1), 128), 512)
    Mp, Np, Kp = _round_up(M, tm), _round_up(N, tn), _round_up(K, tk)

    xp = _pad2d(x.astype(jnp.float32), Mp, Kp).astype(jnp.bfloat16)
    wp = _pad2d(w.astype(jnp.float32), Kp, Np).astype(jnp.bfloat16)
    bp = _pad2d(b.reshape(1, N).astype(jnp.float32), 1, Np)

    out = pl.pallas_call(
        functools.partial(_matmul_epilogue_kernel, act=act),
        out_shape=jax.ShapeDtypeStruct((Mp, Np), jnp.float32),
        grid_spec=pltpu.PrefetchScalarGridSpec(
            num_scalar_prefetch=0,
            grid=(Mp // tm, Np // tn, Kp // tk),
            in_specs=[
                pl.BlockSpec((tm, tk), lambda i, j, k: (i, k)),
                pl.BlockSpec((tk, tn), lambda i, j, k: (k, j)),
                pl.BlockSpec((1, tn), lambda i, j, k: (0, j)),
            ],
            out_specs=pl.BlockSpec((tm, tn), lambda i, j, k: (i, j)),
            scratch_shapes=[pltpu.VMEM((tm, tn), jnp.float32)],
        ),
        compiler_params=pltpu.CompilerParams(
            dimension_semantics=("parallel", "parallel", "arbitrary"),
            vmem_limit_bytes=32 * 1024 * 1024,
        ),
    )(xp, wp, bp)
    return out[:M, :N]


# ----------------------------------------------------------------------------
# fused 2-layer MLP head: act2(act1(x@w1+b1) @ w2 + b2) in a single kernel
# ----------------------------------------------------------------------------
def _mlp2_kernel(x_ref, w1_ref, b1_ref, w2_ref, b2_ref, o_ref, *, act1, act2):
    h = jnp.dot(x_ref[...], w1_ref[...],
                preferred_element_type=jnp.float32) + b1_ref[...]
    h = _apply_act(h, act1).astype(w2_ref.dtype)
    y = jnp.dot(h, w2_ref[...],
                preferred_element_type=jnp.float32) + b2_ref[...]
    o_ref[...] = _apply_act(y, act2).astype(o_ref.dtype)


def fused_mlp2(x, w1, b1, w2, b2, act1, act2=None):
    M, K1 = x.shape
    _, N1 = w1.shape
    _, N2 = w2.shape
    tm = min(_round_up(max(M, 1), 16), 512)
    Mp = _round_up(M, tm)
    K1p, N1p, N2p = (_round_up(K1, 128), _round_up(N1, 128), _round_up(N2, 128))

    xp = _pad2d(x.astype(jnp.float32), Mp, K1p).astype(jnp.bfloat16)
    w1p = _pad2d(w1.astype(jnp.float32), K1p, N1p).astype(jnp.bfloat16)
    b1p = _pad2d(b1.reshape(1, N1).astype(jnp.float32), 1, N1p)
    w2p = _pad2d(w2.astype(jnp.float32), N1p, N2p).astype(jnp.bfloat16)
    b2p = _pad2d(b2.reshape(1, N2).astype(jnp.float32), 1, N2p)

    out = pl.pallas_call(
        functools.partial(_mlp2_kernel, act1=act1, act2=act2),
        out_shape=jax.ShapeDtypeStruct((Mp, N2p), jnp.float32),
        grid_spec=pltpu.PrefetchScalarGridSpec(
            num_scalar_prefetch=0,
            grid=(Mp // tm,),
            in_specs=[
                pl.BlockSpec((tm, K1p), lambda i: (i, 0)),
                pl.BlockSpec((K1p, N1p), lambda i: (0, 0)),
                pl.BlockSpec((1, N1p), lambda i: (0, 0)),
                pl.BlockSpec((N1p, N2p), lambda i: (0, 0)),
                pl.BlockSpec((1, N2p), lambda i: (0, 0)),
            ],
            out_specs=pl.BlockSpec((tm, N2p), lambda i: (i, 0)),
        ),
        compiler_params=pltpu.CompilerParams(
            dimension_semantics=("parallel",),
            vmem_limit_bytes=32 * 1024 * 1024,
        ),
    )(xp, w1p, b1p, w2p, b2p)
    return out[:M, :N2]


# ----------------------------------------------------------------------------
# standalone activation (only for activations NOT following conv/linear);
# lane-dense flattening so the VPU pass uses full vregs.
# ----------------------------------------------------------------------------
def _activation_kernel(x_ref, o_ref, *, act):
    o_ref[...] = _apply_act(x_ref[...], act)


def pallas_activation(x, act):
    shape = x.shape
    total = int(np.prod(shape))
    rows = _round_up(pl.cdiv(total, 128), 8)
    tr = rows
    if rows > 1024:
        tr = 512
        rows = _round_up(rows, tr)
    flat = jnp.pad(x.reshape(-1), (0, rows * 128 - total)).reshape(rows, 128)
    y = pl.pallas_call(
        functools.partial(_activation_kernel, act=act),
        out_shape=jax.ShapeDtypeStruct((rows, 128), flat.dtype),
        grid=(rows // tr,),
        in_specs=[pl.BlockSpec((tr, 128), lambda i: (i, 0))],
        out_specs=pl.BlockSpec((tr, 128), lambda i: (i, 0)),
        compiler_params=pltpu.CompilerParams(
            dimension_semantics=("parallel",)),
    )(flat)
    return y.reshape(-1)[:total].reshape(shape)


# ----------------------------------------------------------------------------
# spatial reduce (NHWC): (B,H,W,C) -> (B,C), lane-dense over padded channels
# ----------------------------------------------------------------------------
def _spatial_reduce_kernel(x_ref, o_ref, *, op, inv_hw):
    x = x_ref[...]                                  # (B, HWp, Cp)
    if op == "mean":
        o_ref[...] = jnp.sum(x, axis=1) * inv_hw    # sum * 1/(H*W), one scalar mul
    else:
        o_ref[...] = jnp.max(x, axis=1)


def pallas_spatial_reduce_nhwc(x, op):
    B, H, W, C = x.shape
    HW = H * W
    HWp = _round_up(HW, 8)
    Cp = _round_up(C, 128)
    pad_val = 0.0 if op == "mean" else -jnp.inf
    x2 = jnp.pad(x.reshape(B, HW, C),
                 ((0, 0), (0, HWp - HW), (0, Cp - C)),
                 constant_values=pad_val).astype(jnp.float32)
    y = pl.pallas_call(
        functools.partial(_spatial_reduce_kernel, op=op, inv_hw=1.0 / HW),
        out_shape=jax.ShapeDtypeStruct((B, Cp), jnp.float32),
        grid=(1,),
        in_specs=[pl.BlockSpec((B, HWp, Cp), lambda i: (0, 0, 0))],
        out_specs=pl.BlockSpec((B, Cp), lambda i: (0, 0)),
    )(x2)
    return y[:, :C]


# ----------------------------------------------------------------------------
# parameter init (mirrors init_module: orthogonal W with relu gain, zero bias)
# ----------------------------------------------------------------------------
def orthogonal_init(key, shape, gain):
    rows = shape[0]
    cols = int(np.prod(shape[1:]))
    a = jax.random.normal(key, (rows, cols), dtype=jnp.float32)
    if rows < cols:
        a = a.T
    q, r = jnp.linalg.qr(a)
    d = jnp.diagonal(r)
    q = q * jnp.where(d >= 0, 1.0, -1.0)   # sign fix without zeroing columns
    if rows < cols:
        q = q.T
    return (gain * q).reshape(shape).astype(jnp.float32)


RELU_GAIN = float(np.sqrt(2.0))  # nn.init.calculate_gain('relu')


# ----------------------------------------------------------------------------
# im2col on NHWC (JAX glue) — conv becomes a single fused matmul
# ----------------------------------------------------------------------------
def im2col_nhwc(x, kh, kw, stride, padding):
    B, H, W, C = x.shape
    xp = jnp.pad(x, ((0, 0), (padding, padding), (padding, padding), (0, 0)))
    Ho = (H + 2 * padding - kh) // stride + 1
    Wo = (W + 2 * padding - kw) // stride + 1
    cols = []
    for i in range(kh):
        for j in range(kw):
            cols.append(
                xp[:, i:i + stride * Ho:stride, j:j + stride * Wo:stride, :])
    col = jnp.concatenate(cols, axis=-1)            # (B,Ho,Wo, kh*kw*C)
    return col.reshape(B * Ho * Wo, kh * kw * C), Ho, Wo


# ----------------------------------------------------------------------------
# LayerTrunk (JAX/Pallas port of graphrl.modules.trunks.LayerTrunk)
# ----------------------------------------------------------------------------
class PallasLayerTrunk:
    def __init__(self, input_shape, all_layer_params, key):
        ops = []
        shape = list(input_shape)
        for layer_params in all_layer_params:
            key, sub = jax.random.split(key)
            shape, op = self._make_op(shape, layer_params, sub)
            ops.append(op)
        self.ops = self._fuse(ops)
        self.final_shape = shape

    def get_output_shape(self):
        return self.final_shape

    # ------------------------------------------------------------------ build
    def _make_op(self, shape, lp, key):
        layer_type = lp["type"]
        args = list(lp.get("args", ()))
        kwargs = dict(lp.get("kwargs", {}))

        if layer_type == "activation":
            act = args[0]
            if act not in ("relu", "tanh"):
                raise ValueError("unsupported activation {}".format(act))
            return shape, {"kind": "act", "act": act}

        elif layer_type == "conv":
            c_in, H, W = shape
            out_c, k = args[0], args[1]
            stride = kwargs.get("stride", 1)
            padding = kwargs.get("padding", 0)
            w = orthogonal_init(key, (out_c, c_in, k, k), RELU_GAIN)
            # match im2col (i, j, c) column ordering: wmat[(i*kw+j)*C + c, o]
            wmat = jnp.transpose(w, (2, 3, 1, 0)).reshape(k * k * c_in, out_c)
            b = jnp.zeros((out_c,), jnp.float32)
            Ho = (H + 2 * padding - k) // stride + 1
            Wo = (W + 2 * padding - k) // stride + 1
            op = {"kind": "conv", "wmat": wmat, "b": b, "k": k,
                  "stride": stride, "pad": padding, "out_c": out_c,
                  "Ho": Ho, "Wo": Wo, "act": None}
            return [out_c, Ho, Wo], op

        elif layer_type == "spatial_reduce":
            if len(shape) != 3:
                raise ValueError
            rop = args[0]
            if rop not in ("mean", "max"):
                raise ValueError("unsupported reduce {}".format(rop))
            return shape[:1], {"kind": "reduce", "op": rop}

        elif layer_type == "flatten":
            return [int(np.prod(shape))], {"kind": "flatten"}

        elif layer_type == "linear":
            in_f = shape[0]
            out_f = args[0]
            w = orthogonal_init(key, (out_f, in_f), RELU_GAIN)   # PyTorch (out,in)
            b = jnp.zeros((out_f,), jnp.float32)
            op = {"kind": "linear", "w": w.T, "b": b, "act": None}  # store (in,out)
            return [out_f], op

        else:
            raise ValueError("Unknown layer type {}".format(layer_type))

    def _fuse(self, ops):
        # pass 1: fold an activation into the preceding conv/linear epilogue
        fused = []
        for op in ops:
            if (op["kind"] == "act" and fused
                    and fused[-1]["kind"] in ("conv", "linear")
                    and fused[-1]["act"] is None):
                fused[-1]["act"] = op["act"]
            else:
                fused.append(op)
        # pass 2: fold linear(+act) followed by linear(+act) into one kernel
        out, i = [], 0
        while i < len(fused):
            op = fused[i]
            if (op["kind"] == "linear" and i + 1 < len(fused)
                    and fused[i + 1]["kind"] == "linear"
                    and op["w"].shape[0] <= 1024
                    and op["w"].shape[1] <= 1024
                    and fused[i + 1]["w"].shape[1] <= 1024):
                nxt = fused[i + 1]
                out.append({"kind": "mlp2",
                            "w1": op["w"], "b1": op["b"], "act1": op["act"],
                            "w2": nxt["w"], "b2": nxt["b"], "act2": nxt["act"]})
                i += 2
            else:
                out.append(op)
                i += 1
        return out

    # ---------------------------------------------------------------- forward
    def __call__(self, x):
        if x.ndim == 4:                              # NCHW at module boundary
            x = jnp.transpose(x, (0, 2, 3, 1))       # -> NHWC internally
        for op in self.ops:
            kind = op["kind"]
            if kind == "conv":
                B = x.shape[0]
                col, Ho, Wo = im2col_nhwc(x, op["k"], op["k"],
                                          op["stride"], op["pad"])
                y = fused_matmul(col, op["wmat"], op["b"], op["act"])
                x = y.reshape(B, Ho, Wo, op["out_c"])
            elif kind == "linear":
                x = fused_matmul(x, op["w"], op["b"], op["act"])
            elif kind == "mlp2":
                x = fused_mlp2(x, op["w1"], op["b1"], op["w2"], op["b2"],
                               op["act1"], op["act2"])
            elif kind == "act":
                x = pallas_activation(x, op["act"])
            elif kind == "reduce":
                x = pallas_spatial_reduce_nhwc(x, op["op"])
            elif kind == "flatten":
                if x.ndim == 4:
                    x = jnp.transpose(x, (0, 3, 1, 2))   # PyTorch C*H*W order
                x = x.reshape(x.shape[0], -1)
            else:
                raise ValueError(kind)
        if x.ndim == 4:
            x = jnp.transpose(x, (0, 3, 1, 2))       # back to NCHW at boundary
        return x


# ----------------------------------------------------------------------------
if __name__ == "__main__":
    # Small CNN trunk: conv -> relu -> conv -> relu -> spatial mean -> MLP head.
    config = [
        {"type": "conv", "args": [8, 3], "kwargs": {"stride": 1, "padding": 1}},
        {"type": "activation", "args": ["relu"]},
        {"type": "conv", "args": [16, 3], "kwargs": {"stride": 2, "padding": 1}},
        {"type": "activation", "args": ["relu"]},
        {"type": "spatial_reduce", "args": ["mean"]},
        {"type": "linear", "args": [32]},
        {"type": "activation", "args": ["relu"]},
        {"type": "linear", "args": [16]},
    ]
    input_shape = (4, 16, 16)  # (C, H, W), as in the PyTorch module
    trunk = PallasLayerTrunk(input_shape, config, jax.random.PRNGKey(42))

    x = jax.random.normal(jax.random.PRNGKey(0), (2,) + input_shape, jnp.float32)
    fwd = jax.jit(trunk.__call__)
    y = fwd(x)
    jax.block_until_ready(y)

    assert list(y.shape) == [2] + list(trunk.get_output_shape()), y.shape
    assert bool(jnp.all(jnp.isfinite(y)))
    print("KERNEL_OK")
</pallas_src>

<mosaic_0001>
module attributes {stable_mosaic.version = 11 : i64} {
  func.func @_matmul_epilogue_kernel(%arg0: i32, %arg1: i32, %arg2: i32, %arg3: memref<512x128xbf16, #tpu.memory_space<vmem>>, %arg4: memref<128x128xbf16, #tpu.memory_space<vmem>>, %arg5: memref<1x128xf32, #tpu.memory_space<vmem>>, %arg6: memref<512x128xf32, #tpu.memory_space<vmem>>, %arg7: memref<512x128xf32, #tpu.memory_space<vmem>>) attributes {dimension_semantics = [#tpu.dimension_semantics<parallel>, #tpu.dimension_semantics<parallel>, #tpu.dimension_semantics<arbitrary>], iteration_bounds = array<i64: 1, 1, 1>, scalar_prefetch = 0 : i64, scratch_operands = 1 : i64, tpu.core_type = #tpu.core_type<tc>, window_params = [{transform_indices = @transform_0, window_bounds = array<i64: 512, 128>}, {transform_indices = @transform_1, window_bounds = array<i64: 128, 128>}, {transform_indices = @transform_2, window_bounds = array<i64: 1, 128>}, {transform_indices = @transform_3, window_bounds = array<i64: 512, 128>}]} {
    %c0_i32 = arith.constant 0 : i32
    %0 = arith.cmpi eq, %arg2, %c0_i32 : i32
    %1 = arith.extui %0 : i1 to i32
    %c0_i32_0 = arith.constant 0 : i32
    %2 = arith.cmpi ne, %1, %c0_i32_0 : i32
    scf.if %2 {
      %cst_10 = arith.constant 0.000000e+00 : f32
      %12 = vector.broadcast %cst_10 : f32 to vector<512x128xf32>
      %c0_11 = arith.constant 0 : index
      %c0_12 = arith.constant 0 : index
      %13 = vector.load %arg7[%c0_11, %c0_12] : memref<512x128xf32, #tpu.memory_space<vmem>>, vector<512x128xf32>
      tpu.vector_store %arg7[%c0_11, %c0_12], %12 {strides = array<i32>} : memref<512x128xf32, #tpu.memory_space<vmem>>, vector<512x128xf32>,
    } else {
    }
    %c0 = arith.constant 0 : index
    %c0_1 = arith.constant 0 : index
    %3 = vector.load %arg7[%c0, %c0_1] : memref<512x128xf32, #tpu.memory_space<vmem>>, vector<512x128xf32>
    %c0_2 = arith.constant 0 : index
    %c0_3 = arith.constant 0 : index
    %4 = vector.load %arg3[%c0_2, %c0_3] : memref<512x128xbf16, #tpu.memory_space<vmem>>, vector<512x128xbf16>
    %c0_4 = arith.constant 0 : index
    %c0_5 = arith.constant 0 : index
    %5 = vector.load %arg4[%c0_4, %c0_5] : memref<128x128xbf16, #tpu.memory_space<vmem>>, vector<128x128xbf16>
    %cst = arith.constant dense<0.000000e+00> : vector<512x128xf32>
    %6 = tpu.matmul %4, %5, %cst {dimension_numbers = #tpu.dot_dimension_numbers<[1], [0], [0], [1], [0, 0, 1, 1], [], []>} : vector<512x128xbf16>, vector<128x128xbf16>, vector<512x128xf32> -> vector<512x128xf32>
    %7 = arith.addf %3, %6 : vector<512x128xf32>
    %c0_6 = arith.constant 0 : index
    %c0_7 = arith.constant 0 : index
    %8 = vector.load %arg7[%c0_6, %c0_7] : memref<512x128xf32, #tpu.memory_space<vmem>>, vector<512x128xf32>
    tpu.vector_store %arg7[%c0_6, %c0_7], %7 {strides = array<i32>} : memref<512x128xf32, #tpu.memory_space<vmem>>, vector<512x128xf32>,
    %c0_i32_8 = arith.constant 0 : i32
    %9 = arith.cmpi eq, %arg2, %c0_i32_8 : i32
    %10 = arith.extui %9 : i1 to i32
    %c0_i32_9 = arith.constant 0 : i32
    %11 = arith.cmpi ne, %10, %c0_i32_9 : i32
    scf.if %11 {
      %c0_10 = arith.constant 0 : index
      %c0_11 = arith.constant 0 : index
      %12 = vector.load %arg7[%c0_10, %c0_11] : memref<512x128xf32, #tpu.memory_space<vmem>>, vector<512x128xf32>
      %c0_12 = arith.constant 0 : index
      %c0_13 = arith.constant 0 : index
      %13 = vector.load %arg5[%c0_12, %c0_13] : memref<1x128xf32, #tpu.memory_space<vmem>>, vector<1x128xf32>
      %14 = vector.broadcast %13 : vector<1x128xf32> to vector<512x128xf32>
      %15 = arith.addf %12, %14 : vector<512x128xf32>
      %cst_14 = arith.constant 0.000000e+00 : f32
      %16 = vector.broadcast %cst_14 : f32 to vector<512x128xf32>
      %17 = arith.maximumf %15, %16 : vector<512x128xf32>
      %c0_15 = arith.constant 0 : index
      %c0_16 = arith.constant 0 : index
      %18 = vector.load %arg6[%c0_15, %c0_16] : memref<512x128xf32, #tpu.memory_space<vmem>>, vector<512x128xf32>
      tpu.vector_store %arg6[%c0_15, %c0_16], %17 {strides = array<i32>} : memref<512x128xf32, #tpu.memory_space<vmem>>, vector<512x128xf32>,
    } else {
    }
    return
  }
  func.func @transform_0(%arg0: i32, %arg1: i32, %arg2: i32) -> (i32, i32) {
    %c0_i32 = arith.constant 0 : i32
    return %arg0, %arg2 : i32, i32
  }
  func.func @transform_1(%arg0: i32, %arg1: i32, %arg2: i32) -> (i32, i32) {
    %c0_i32 = arith.constant 0 : i32
    return %arg2, %arg1 : i32, i32
  }
  func.func @transform_2(%arg0: i32, %arg1: i32, %arg2: i32) -> (i32, i32) {
    %c0_i32 = arith.constant 0 : i32
    %c0_i32_0 = arith.constant 0 : i32
    return %c0_i32, %arg1 : i32, i32
  }
  func.func @transform_3(%arg0: i32, %arg1: i32, %arg2: i32) -> (i32, i32) {
    %c0_i32 = arith.constant 0 : i32
    return %arg0, %arg1 : i32, i32
  }
}

module attributes {stable_mosaic.version = 11 : i64} {
  func.func @_matmul_epilogue_kernel(%arg0: i32, %arg1: i32, %arg2: i32, %arg3: memref<128x128xbf16, #tpu.memory_space<vmem>>, %arg4: memref<128x128xbf16, #tpu.memory_space<vmem>>, %arg5: memref<1x128xf32, #tpu.memory_space<vmem>>, %arg6: memref<128x128xf32, #tpu.memory_space<vmem>>, %arg7: memref<128x128xf32, #tpu.memory_space<vmem>>) attributes {dimension_semantics = [#tpu.dimension_semantics<parallel>, #tpu.dimension_semantics<parallel>, #tpu.dimension_semantics<arbitrary>], iteration_bounds = array<i64: 1, 1, 1>, scalar_prefetch = 0 : i64, scratch_operands = 1 : i64, tpu.core_type = #tpu.core_type<tc>, window_params = [{transform_indices = @transform_0, window_bounds = array<i64: 128, 128>}, {transform_indices = @transform_1, window_bounds = array<i64: 128, 128>}, {transform_indices = @transform_2, window_bounds = array<i64: 1, 128>}, {transform_indices = @transform_3, window_bounds = array<i64: 128, 128>}]} {
    %c0_i32 = arith.constant 0 : i32
    %0 = arith.cmpi eq, %arg2, %c0_i32 : i32
    %1 = arith.extui %0 : i1 to i32
    %c0_i32_0 = arith.constant 0 : i32
    %2 = arith.cmpi ne, %1, %c0_i32_0 : i32
    scf.if %2 {
      %cst_10 = arith.constant 0.000000e+00 : f32
      %12 = vector.broadcast %cst_10 : f32 to vector<128x128xf32>
      %c0_11 = arith.constant 0 : index
      %c0_12 = arith.constant 0 : index
      %13 = vector.load %arg7[%c0_11, %c0_12] : memref<128x128xf32, #tpu.memory_space<vmem>>, vector<128x128xf32>
      tpu.vector_store %arg7[%c0_11, %c0_12], %12 {strides = array<i32>} : memref<128x128xf32, #tpu.memory_space<vmem>>, vector<128x128xf32>,
    } else {
    }
    %c0 = arith.constant 0 : index
    %c0_1 = arith.constant 0 : index
    %3 = vector.load %arg7[%c0, %c0_1] : memref<128x128xf32, #tpu.memory_space<vmem>>, vector<128x128xf32>
    %c0_2 = arith.constant 0 : index
    %c0_3 = arith.constant 0 : index
    %4 = vector.load %arg3[%c0_2, %c0_3] : memref<128x128xbf16, #tpu.memory_space<vmem>>, vector<128x128xbf16>
    %c0_4 = arith.constant 0 : index
    %c0_5 = arith.constant 0 : index
    %5 = vector.load %arg4[%c0_4, %c0_5] : memref<128x128xbf16, #tpu.memory_space<vmem>>, vector<128x128xbf16>
    %cst = arith.constant dense<0.000000e+00> : vector<128x128xf32>
    %6 = tpu.matmul %4, %5, %cst {dimension_numbers = #tpu.dot_dimension_numbers<[1], [0], [0], [1], [0, 0, 1, 1], [], []>} : vector<128x128xbf16>, vector<128x128xbf16>, vector<128x128xf32> -> vector<128x128xf32>
    %7 = arith.addf %3, %6 : vector<128x128xf32>
    %c0_6 = arith.constant 0 : index
    %c0_7 = arith.constant 0 : index
    %8 = vector.load %arg7[%c0_6, %c0_7] : memref<128x128xf32, #tpu.memory_space<vmem>>, vector<128x128xf32>
    tpu.vector_store %arg7[%c0_6, %c0_7], %7 {strides = array<i32>} : memref<128x128xf32, #tpu.memory_space<vmem>>, vector<128x128xf32>,
    %c0_i32_8 = arith.constant 0 : i32
    %9 = arith.cmpi eq, %arg2, %c0_i32_8 : i32
    %10 = arith.extui %9 : i1 to i32
    %c0_i32_9 = arith.constant 0 : i32
    %11 = arith.cmpi ne, %10, %c0_i32_9 : i32
    scf.if %11 {
      %c0_10 = arith.constant 0 : index
      %c0_11 = arith.constant 0 : index
      %12 = vector.load %arg7[%c0_10, %c0_11] : memref<128x128xf32, #tpu.memory_space<vmem>>, vector<128x128xf32>
      %c0_12 = arith.constant 0 : index
      %c0_13 = arith.constant 0 : index
      %13 = vector.load %arg5[%c0_12, %c0_13] : memref<1x128xf32, #tpu.memory_space<vmem>>, vector<1x128xf32>
      %14 = vector.broadcast %13 : vector<1x128xf32> to vector<128x128xf32>
      %15 = arith.addf %12, %14 : vector<128x128xf32>
      %cst_14 = arith.constant 0.000000e+00 : f32
      %16 = vector.broadcast %cst_14 : f32 to vector<128x128xf32>
      %17 = arith.maximumf %15, %16 : vector<128x128xf32>
      %c0_15 = arith.constant 0 : index
      %c0_16 = arith.constant 0 : index
      %18 = vector.load %arg6[%c0_15, %c0_16] : memref<128x128xf32, #tpu.memory_space<vmem>>, vector<128x128xf32>
      tpu.vector_store %arg6[%c0_15, %c0_16], %17 {strides = array<i32>} : memref<128x128xf32, #tpu.memory_space<vmem>>, vector<128x128xf32>,
    } else {
    }
    return
  }
  func.func @transform_0(%arg0: i32, %arg1: i32, %arg2: i32) -> (i32, i32) {
    %c0_i32 = arith.constant 0 : i32
    return %arg0, %arg2 : i32, i32
  }
  func.func @transform_1(%arg0: i32, %arg1: i32, %arg2: i32) -> (i32, i32) {
    %c0_i32 = arith.constant 0 : i32
    return %arg2, %arg1 : i32, i32
  }
  func.func @transform_2(%arg0: i32, %arg1: i32, %arg2: i32) -> (i32, i32) {
    %c0_i32 = arith.constant 0 : i32
    %c0_i32_0 = arith.constant 0 : i32
    return %c0_i32, %arg1 : i32, i32
  }
  func.func @transform_3(%arg0: i32, %arg1: i32, %arg2: i32) -> (i32, i32) {
    %c0_i32 = arith.constant 0 : i32
    return %arg0, %arg1 : i32, i32
  }
}

module attributes {stable_mosaic.version = 11 : i64} {
  func.func @_spatial_reduce_kernel(%arg0: i32, %arg1: memref<2x64x128xf32, #tpu.memory_space<vmem>>, %arg2: memref<2x128xf32, #tpu.memory_space<vmem>>) attributes {dimension_semantics = [#tpu.dimension_semantics<arbitrary>], iteration_bounds = array<i64: 1>, scalar_prefetch = 0 : i64, scratch_operands = 0 : i64, tpu.core_type = #tpu.core_type<tc>, window_params = [{pipeline_mode = #tpu.pipeline_mode<synchronous>, transform_indices = @transform_0, window_bounds = array<i64: 2, 64, 128>}, {pipeline_mode = #tpu.pipeline_mode<synchronous>, transform_indices = @transform_1, window_bounds = array<i64: 2, 128>}]} {
    %c0 = arith.constant 0 : index
    %c0_0 = arith.constant 0 : index
    %c0_1 = arith.constant 0 : index
    %0 = vector.load %arg1[%c0, %c0_0, %c0_1] : memref<2x64x128xf32, #tpu.memory_space<vmem>>, vector<2x64x128xf32>
    %cst = arith.constant dense<0.000000e+00> : vector<2x128xf32>
    %1 = vector.multi_reduction <add>, %0, %cst [1] : vector<2x64x128xf32> to vector<2x128xf32>
    %cst_2 = arith.constant 1.562500e-02 : f32
    %2 = vector.broadcast %cst_2 : f32 to vector<2x128xf32>
    %3 = arith.mulf %1, %2 : vector<2x128xf32>
    %c0_3 = arith.constant 0 : index
    %c0_4 = arith.constant 0 : index
    %4 = vector.load %arg2[%c0_3, %c0_4] : memref<2x128xf32, #tpu.memory_space<vmem>>, vector<2x128xf32>
    tpu.vector_store %arg2[%c0_3, %c0_4], %3 {strides = array<i32>} : memref<2x128xf32, #tpu.memory_space<vmem>>, vector<2x128xf32>,
    return
  }
  func.func @transform_0(%arg0: i32) -> (i32, i32, i32) {
    %c0_i32 = arith.constant 0 : i32
    %c0_i32_0 = arith.constant 0 : i32
    %c0_i32_1 = arith.constant 0 : i32
    %c0_i32_2 = arith.constant 0 : i32
    return %c0_i32, %c0_i32_0, %c0_i32_1 : i32, i32, i32
  }
  func.func @transform_1(%arg0: i32) -> (i32, i32) {
    %c0_i32 = arith.constant 0 : i32
    %c0_i32_0 = arith.constant 0 : i32
    %c0_i32_1 = arith.constant 0 : i32
    return %c0_i32, %c0_i32_0 : i32, i32
  }
}

module attributes {stable_mosaic.version = 11 : i64} {
  func.func @_mlp2_kernel(%arg0: i32, %arg1: memref<16x128xbf16, #tpu.memory_space<vmem>>, %arg2: memref<128x128xbf16, #tpu.memory_space<vmem>>, %arg3: memref<1x128xf32, #tpu.memory_space<vmem>>, %arg4: memref<128x128xbf16, #tpu.memory_space<vmem>>, %arg5: memref<1x128xf32, #tpu.memory_space<vmem>>, %arg6: memref<16x128xf32, #tpu.memory_space<vmem>>) attributes {dimension_semantics = [#tpu.dimension_semantics<parallel>], iteration_bounds = array<i64: 1>, scalar_prefetch = 0 : i64, scratch_operands = 0 : i64, tpu.core_type = #tpu.core_type<tc>, window_params = [{transform_indices = @transform_0, window_bounds = array<i64: 16, 128>}, {pipeline_mode = #tpu.pipeline_mode<synchronous>, transform_indices = @transform_1, window_bounds = array<i64: 128, 128>}, {pipeline_mode = #tpu.pipeline_mode<synchronous>, transform_indices = @transform_2, window_bounds = array<i64: 1, 128>}, {pipeline_mode = #tpu.pipeline_mode<synchronous>, transform_indices = @transform_3, window_bounds = array<i64: 128, 128>}, {pipeline_mode = #tpu.pipeline_mode<synchronous>, transform_indices = @transform_4, window_bounds = array<i64: 1, 128>}, {transform_indices = @transform_5, window_bounds = array<i64: 16, 128>}]} {
    %c0 = arith.constant 0 : index
    %c0_0 = arith.constant 0 : index
    %0 = vector.load %arg1[%c0, %c0_0] : memref<16x128xbf16, #tpu.memory_space<vmem>>, vector<16x128xbf16>
    %c0_1 = arith.constant 0 : index
    %c0_2 = arith.constant 0 : index
    %1 = vector.load %arg2[%c0_1, %c0_2] : memref<128x128xbf16, #tpu.memory_space<vmem>>, vector<128x128xbf16>
    %cst = arith.constant dense<0.000000e+00> : vector<16x128xf32>
    %2 = tpu.matmul %0, %1, %cst {dimension_numbers = #tpu.dot_dimension_numbers<[1], [0], [0], [1], [0, 0, 1, 1], [], []>} : vector<16x128xbf16>, vector<128x128xbf16>, vector<16x128xf32> -> vector<16x128xf32>
    %c0_3 = arith.constant 0 : index
    %c0_4 = arith.constant 0 : index
    %3 = vector.load %arg3[%c0_3, %c0_4] : memref<1x128xf32, #tpu.memory_space<vmem>>, vector<1x128xf32>
    %4 = vector.broadcast %3 : vector<1x128xf32> to vector<16x128xf32>
    %5 = arith.addf %2, %4 : vector<16x128xf32>
    %cst_5 = arith.constant 0.000000e+00 : f32
    %6 = vector.broadcast %cst_5 : f32 to vector<16x128xf32>
    %7 = arith.maximumf %5, %6 : vector<16x128xf32>
    %8 = arith.truncf %7 : vector<16x128xf32> to vector<16x128xbf16>
    %c0_6 = arith.constant 0 : index
    %c0_7 = arith.constant 0 : index
    %9 = vector.load %arg4[%c0_6, %c0_7] : memref<128x128xbf16, #tpu.memory_space<vmem>>, vector<128x128xbf16>
    %cst_8 = arith.constant dense<0.000000e+00> : vector<16x128xf32>
    %10 = tpu.matmul %8, %9, %cst_8 {dimension_numbers = #tpu.dot_dimension_numbers<[1], [0], [0], [1], [0, 0, 1, 1], [], []>} : vector<16x128xbf16>, vector<128x128xbf16>, vector<16x128xf32> -> vector<16x128xf32>
    %c0_9 = arith.constant 0 : index
    %c0_10 = arith.constant 0 : index
    %11 = vector.load %arg5[%c0_9, %c0_10] : memref<1x128xf32, #tpu.memory_space<vmem>>, vector<1x128xf32>
    %12 = vector.broadcast %11 : vector<1x128xf32> to vector<16x128xf32>
    %13 = arith.addf %10, %12 : vector<16x128xf32>
    %c0_11 = arith.constant 0 : index
    %c0_12 = arith.constant 0 : index
    %14 = vector.load %arg6[%c0_11, %c0_12] : memref<16x128xf32, #tpu.memory_space<vmem>>, vector<16x128xf32>
    tpu.vector_store %arg6[%c0_11, %c0_12], %13 {strides = array<i32>} : memref<16x128xf32, #tpu.memory_space<vmem>>, vector<16x128xf32>,
    return
  }
  func.func @transform_0(%arg0: i32) -> (i32, i32) {
    %c0_i32 = arith.constant 0 : i32
    %c0_i32_0 = arith.constant 0 : i32
    return %arg0, %c0_i32 : i32, i32
  }
  func.func @transform_1(%arg0: i32) -> (i32, i32) {
    %c0_i32 = arith.constant 0 : i32
    %c0_i32_0 = arith.constant 0 : i32
    %c0_i32_1 = arith.constant 0 : i32
    return %c0_i32, %c0_i32_0 : i32, i32
  }
  func.func @transform_2(%arg0: i32) -> (i32, i32) {
    %c0_i32 = arith.constant 0 : i32
    %c0_i32_0 = arith.constant 0 : i32
    %c0_i32_1 = arith.constant 0 : i32
    return %c0_i32, %c0_i32_0 : i32, i32
  }
  func.func @transform_3(%arg0: i32) -> (i32, i32) {
    %c0_i32 = arith.constant 0 : i32
    %c0_i32_0 = arith.constant 0 : i32
    %c0_i32_1 = arith.constant 0 : i32
    return %c0_i32, %c0_i32_0 : i32, i32
  }
  func.func @transform_4(%arg0: i32) -> (i32, i32) {
    %c0_i32 = arith.constant 0 : i32
    %c0_i32_0 = arith.constant 0 : i32
    %c0_i32_1 = arith.constant 0 : i32
    return %c0_i32, %c0_i32_0 : i32, i32
  }
  func.func @transform_5(%arg0: i32) -> (i32, i32) {
    %c0_i32 = arith.constant 0 : i32
    %c0_i32_0 = arith.constant 0 : i32
    return %arg0, %c0_i32 : i32, i32
  }
}

</mosaic_0001>

<bundles_post_ra>
// kernel: a_call__.4
= control target key start
LH: loop header
LB: loop body
LE: loop exit
PB: predicated region body
PF: predicated region fallthrough
CT: control target
= control target key end

     0   :  { %s1772_s1 = inlined_call_operand.vmem [shape: bf16[128,128], index: 1, kind: input, shape index: {}]   ;;  %s1773_s0 = inlined_call_operand.vmem [shape: bf16[512,128], index: 0, kind: input, shape index: {}]   ;;  %s1774_s2 = inlined_call_operand.vmem [shape: f32[1,128], index: 2, kind: input, shape index: {}]   ;;  %s1775_s3 = inlined_call_operand.vmem [shape: f32[512,128], index: 3, kind: output, shape index: {}]  }
   0x1   :  { %v1331_v0 = vld [vmem:[%s1772_s1 + $0x38] sm:$0xff]   ;;  %v1332_v1 = vld [vmem:[%s1772_s1 + $0x30] sm:$0xff]   ;;  %v1333_v2 = vld [vmem:[%s1772_s1 + $0x28] sm:$0xff]  }
   0x2   :  { %1235 = vmatprep.subr.bf16.mxu0 %v1331_v0  ;;  %1315 = vmatprep.subr.bf16.mxu1 %v1331_v0  ;;  %v1334_v3 = vld [vmem:[%s1772_s1 + $0x20] sm:$0xff]   ;;  %v1335_v6 = vld [vmem:[%s1772_s1 + $0x18] sm:$0xff]   ;;  %v1336_v7 = vld [vmem:[%s1772_s1 + $0x10] sm:$0xff]  }
   0x3   :  { %1236 = vmatpush3.bf16.msra.mxu0 %v1331_v0  ;;  %1323 = vmatpush3.bf16.msra.mxu1 %v1331_v0  ;;  %v1339_v4 = vld [vmem:[%s1773_s0] sm:$0xff]   ;;  %v1337_v8 = vld [vmem:[%s1772_s1 + $0x8] sm:$0xff]   ;;  %v1343_v12 = vld [vmem:[%s1773_s0 + $0x10] sm:$0xff]  }
   0x4   :  { %1237 = vmatprep.subr.bf16.mxu0 %v1332_v1  ;;  %1316 = vmatprep.subr.bf16.mxu1 %v1332_v1  ;;  %v1340_v5 = vld [vmem:[%s1773_s0 + $0x80] sm:$0xff]   ;;  %v1341_v10 = vld [vmem:[%s1773_s0 + $0x8] sm:$0xff]   ;;  %v1344_v13 = vld [vmem:[%s1773_s0 + $0x90] sm:$0xff]  }
   0x5   :  { %1251 = vmatprep.mubr.bf16.mxu0 %v1339_v4  ;;  %1283 = vmatprep.mubr.bf16.mxu1 %v1340_v5  ;;  %v1338_v9 = vld [vmem:[%s1772_s1] sm:$0xff]   ;;  %v1342_v11 = vld [vmem:[%s1773_s0 + $0x88] sm:$0xff]   ;;  %v1345_v14 = vld [vmem:[%s1773_s0 + $0x18] sm:$0xff]  }
   0x6   :  { %v1346_v15 = vld [vmem:[%s1773_s0 + $0x98] sm:$0xff]   ;;  %v1347_v16 = vld [vmem:[%s1773_s0 + $0x20] sm:$0xff]   ;;  %v1349_v18 = vld [vmem:[%s1773_s0 + $0x28] sm:$0xff]  }
   0x7   :  { %1238 = vmatpush3.bf16.msra.mxu0 %v1332_v1  ;;  %1324 = vmatpush3.bf16.msra.mxu1 %v1332_v1  ;;  %v1348_v17 = vld [vmem:[%s1773_s0 + $0xa0] sm:$0xff]   ;;  %v1350_v19 = vld [vmem:[%s1773_s0 + $0xa8] sm:$0xff]   ;;  %v1351_v20 = vld [vmem:[%s1773_s0 + $0x30] sm:$0xff]  }
   0x8   :  { %1239 = vmatprep.subr.bf16.mxu0 %v1333_v2  ;;  %1317 = vmatprep.subr.bf16.mxu1 %v1333_v2  ;;  %v1352_v21 = vld [vmem:[%s1773_s0 + $0xb0] sm:$0xff]   ;;  %v1353_v22 = vld [vmem:[%s1773_s0 + $0x38] sm:$0xff]   ;;  %v1355_v24 = vld [vmem:[%s1773_s0 + $0x40] sm:$0xff]  }
   0x9   :  { %v1354_v23 = vld [vmem:[%s1773_s0 + $0xb8] sm:$0xff]   ;;  %v1356_v25 = vld [vmem:[%s1773_s0 + $0xc0] sm:$0xff]   ;;  %v1357_v26 = vld [vmem:[%s1773_s0 + $0x48] sm:$0xff]  }
   0xa   :  { %v1358_v27 = vld [vmem:[%s1773_s0 + $0xc8] sm:$0xff]   ;;  %v1359_v28 = vld [vmem:[%s1773_s0 + $0x50] sm:$0xff]   ;;  %v1361_v30 = vld [vmem:[%s1773_s0 + $0x58] sm:$0xff]  }
   0xb   :  { %1240 = vmatpush3.bf16.msra.mxu0 %v1333_v2  ;;  %1325 = vmatpush3.bf16.msra.mxu1 %v1333_v2  ;;  %v1360_v29 = vld [vmem:[%s1773_s0 + $0xd0] sm:$0xff]   ;;  %v1362_v31 = vld [vmem:[%s1773_s0 + $0xd8] sm:$0xff]   ;;  %v1363_v32 = vld [vmem:[%s1773_s0 + $0x60] sm:$0xff]  }
   0xc   :  { %1241 = vmatprep.subr.bf16.mxu0 %v1334_v3  ;;  %1318 = vmatprep.subr.bf16.mxu1 %v1334_v3  ;;  %v1364_v33 = vld [vmem:[%s1773_s0 + $0xe0] sm:$0xff]   ;;  %v1365_v34 = vld [vmem:[%s1773_s0 + $0x68] sm:$0xff]   ;;  %v1367_v36 = vld [vmem:[%s1773_s0 + $0x70] sm:$0xff]  }
   0xd   :  { %v1366_v35 = vld [vmem:[%s1773_s0 + $0xe8] sm:$0xff]   ;;  %v1368_v37 = vld [vmem:[%s1773_s0 + $0xf0] sm:$0xff]   ;;  %v1369_v38 = vld [vmem:[%s1773_s0 + $0x78] sm:$0xff]  }
   0xe   :  { %v1370_v39 = vld [vmem:[%s1773_s0 + $0xf8] sm:$0xff]   ;;  %v1514_v40 = vld [vmem:[%s1774_s2] ss:$0 sm:$0xff] }
   0xf   :  { %1242 = vmatpush3.bf16.msra.mxu0 %v1334_v3  ;;  %1326 = vmatpush3.bf16.msra.mxu1 %v1334_v3 }
  0x10   :  { %1243 = vmatprep.subr.bf16.mxu0 %v1335_v6  ;;  %1319 = vmatprep.subr.bf16.mxu1 %v1335_v6 }
  0x13   :  { %1244 = vmatpush3.bf16.msra.mxu0 %v1335_v6  ;;  %1327 = vmatpush3.bf16.msra.mxu1 %v1335_v6 }
  0x14   :  { %1245 = vmatprep.subr.bf16.mxu0 %v1336_v7  ;;  %1320 = vmatprep.subr.bf16.mxu1 %v1336_v7 }
  0x17   :  { %1246 = vmatpush3.bf16.msra.mxu0 %v1336_v7  ;;  %1328 = vmatpush3.bf16.msra.mxu1 %v1336_v7 }
  0x18   :  { %1247 = vmatprep.subr.bf16.mxu0 %v1337_v8  ;;  %1321 = vmatprep.subr.bf16.mxu1 %v1337_v8 }
  0x1b   :  { %1248 = vmatpush3.bf16.msra.mxu0 %v1337_v8  ;;  %1329 = vmatpush3.bf16.msra.mxu1 %v1337_v8 }
  0x1c   :  { %1249 = vmatprep.subr.bf16.mxu0 %v1338_v9  ;;  %1322 = vmatprep.subr.bf16.mxu1 %v1338_v9 }
  0x1f   :  { %1250 = vmatpush3.bf16.msra.mxu0 %v1338_v9  ;;  %1330 = vmatpush3.bf16.msra.mxu1 %v1338_v9 }
  0x22   :  { %1252 = vmatmul.mubr.bf16.vlgmr.msra.gmra.mxu0 %v1341_v10  ;;  %1284 = vmatmul.mubr.bf16.vlgmr.msra.gmra.mxu1 %v1342_v11 }
  0x23   :  { %1255 = vmatprep.mubr.bf16.mxu0 %v1343_v12  ;;  %1287 = vmatprep.mubr.bf16.mxu1 %v1344_v13 }
  0x2a   :  { %1256 = vmatmul.mubr.bf16.gmra.mxu0 %v1345_v14  ;;  %1288 = vmatmul.mubr.bf16.gmra.mxu1 %v1346_v15 }
  0x2b   :  { %1259 = vmatprep.mubr.bf16.mxu0 %v1347_v16  ;;  %1291 = vmatprep.mubr.bf16.mxu1 %v1348_v17 }
  0x32   :  { %1260 = vmatmul.mubr.bf16.gmra.mxu0 %v1349_v18  ;;  %1292 = vmatmul.mubr.bf16.gmra.mxu1 %v1350_v19 }
  0x33   :  { %1263 = vmatprep.mubr.bf16.mxu0 %v1351_v20  ;;  %1295 = vmatprep.mubr.bf16.mxu1 %v1352_v21 }
  0x3a   :  { %1264 = vmatmul.mubr.bf16.gmra.mxu0 %v1353_v22  ;;  %1296 = vmatmul.mubr.bf16.gmra.mxu1 %v1354_v23 }
  0x3b   :  { %1267 = vmatprep.mubr.bf16.mxu0 %v1355_v24  ;;  %1299 = vmatprep.mubr.bf16.mxu1 %v1356_v25 }
  0x42   :  { %1268 = vmatmul.mubr.bf16.gmra.mxu0 %v1357_v26  ;;  %1300 = vmatmul.mubr.bf16.gmra.mxu1 %v1358_v27 }
  0x43   :  { %1271 = vmatprep.mubr.bf16.mxu0 %v1359_v28  ;;  %1303 = vmatprep.mubr.bf16.mxu1 %v1360_v29 }
  0x4a   :  { %1272 = vmatmul.mubr.bf16.gmra.mxu0 %v1361_v30  ;;  %1304 = vmatmul.mubr.bf16.gmra.mxu1 %v1362_v31 }
  0x4b   :  { %1275 = vmatprep.mubr.bf16.mxu0 %v1363_v32  ;;  %1307 = vmatprep.mubr.bf16.mxu1 %v1364_v33 }
  0x52   :  { %1276 = vmatmul.mubr.bf16.gmra.mxu0 %v1365_v34  ;;  %1308 = vmatmul.mubr.bf16.gmra.mxu1 %v1366_v35 }
  0x53   :  { %1279 = vmatprep.mubr.bf16.mxu0 %v1367_v36  ;;  %1311 = vmatprep.mubr.bf16.mxu1 %v1368_v37 }
  0x5a   :  { %1280 = vmatmul.mubr.bf16.gmra.mxu0 %v1369_v38  ;;  %1312 = vmatmul.mubr.bf16.gmra.mxu1 %v1370_v39 }
  0xe2   :  { %v1253_v41 = vpop.f32.mrf.mxu0  ;;  %v1285_v42 = vpop.f32.mrf.mxu1 }
  0xe3   :  { %v960_v43 = vadd.f32 %v1253_v41, %v1514_v40  ;;  %v992_v44 = vadd.f32 %v1285_v42, %v1514_v40 }
  0xe4   :  { %v501_v45 = vpop.f32.mrf.mxu0  ;;  %v629_v46 = vpop.f32.mrf.mxu1 }
  0xe5   :  { %v1024_v47 = vmax.f32 %v960_v43, 0.0  ;;  %v1056_v48 = vmax.f32 %v992_v44, 0.0  ;;  %v958_v49 = vadd.f32 %v1514_v40, %v501_v45  ;;  %v990_v50 = vadd.f32 %v1514_v40, %v629_v46 }
  0xe6   :  { %v1254_v51 = vpop.f32.mrf.mxu0  ;;  %v1286_v52 = vpop.f32.mrf.mxu1 }
  0xe7   :  { %1088 = vst [vmem:[%s1775_s3 + $0x10] sm:$0xff] %v1024_v47  ;;  %1120 = vst [vmem:[%s1775_s3 + $0x110] sm:$0xff] %v1056_v48  ;;  %v1022_v53 = vmax.f32 %v958_v49, 0.0  ;;  %v1054_v54 = vmax.f32 %v990_v50, 0.0  ;;  %v961_v55 = vadd.f32 %v1254_v51, %v1514_v40  ;;  %v993_v56 = vadd.f32 %v1286_v52, %v1514_v40 }
  0xe8   :  { %v504_v57 = vpop.f32.mrf.mxu0  ;;  %v632_v58 = vpop.f32.mrf.mxu1 }
  0xe9   :  { %1086 = vst [vmem:[%s1775_s3] sm:$0xff] %v1022_v53  ;;  %1118 = vst [vmem:[%s1775_s3 + $0x100] sm:$0xff] %v1054_v54  ;;  %v1025_v59 = vmax.f32 %v961_v55, 0.0  ;;  %v1057_v60 = vmax.f32 %v993_v56, 0.0  ;;  %v959_v61 = vadd.f32 %v1514_v40, %v504_v57  ;;  %v991_v62 = vadd.f32 %v1514_v40, %v632_v58 }
  0xea   :  { %v1257_v63 = vpop.f32.mrf.mxu0  ;;  %v1289_v0 = vpop.f32.mrf.mxu1 }
  0xeb   :  { %1089 = vst [vmem:[%s1775_s3 + $0x18] sm:$0xff] %v1025_v59  ;;  %1121 = vst [vmem:[%s1775_s3 + $0x118] sm:$0xff] %v1057_v60  ;;  %v1023_v1 = vmax.f32 %v959_v61, 0.0  ;;  %v1055_v2 = vmax.f32 %v991_v62, 0.0  ;;  %v964_v3 = vadd.f32 %v1257_v63, %v1514_v40  ;;  %v996_v4 = vadd.f32 %v1289_v0, %v1514_v40 }
  0xec   :  { %v517_v5 = vpop.f32.mrf.mxu0  ;;  %v645_v6 = vpop.f32.mrf.mxu1 }
  0xed   :  { %1087 = vst [vmem:[%s1775_s3 + $0x8] sm:$0xff] %v1023_v1  ;;  %1119 = vst [vmem:[%s1775_s3 + $0x108] sm:$0xff] %v1055_v2  ;;  %v1028_v7 = vmax.f32 %v964_v3, 0.0  ;;  %v1060_v8 = vmax.f32 %v996_v4, 0.0  ;;  %v962_v9 = vadd.f32 %v1514_v40, %v517_v5  ;;  %v994_v10 = vadd.f32 %v1514_v40, %v645_v6 }
  0xee   :  { %v1258_v11 = vpop.f32.mrf.mxu0  ;;  %v1290_v12 = vpop.f32.mrf.mxu1 }
  0xef   :  { %1092 = vst [vmem:[%s1775_s3 + $0x30] sm:$0xff] %v1028_v7  ;;  %1124 = vst [vmem:[%s1775_s3 + $0x130] sm:$0xff] %v1060_v8  ;;  %v1026_v13 = vmax.f32 %v962_v9, 0.0  ;;  %v1058_v14 = vmax.f32 %v994_v10, 0.0  ;;  %v965_v15 = vadd.f32 %v1258_v11, %v1514_v40  ;;  %v997_v16 = vadd.f32 %v1290_v12, %v1514_v40 }
  0xf0   :  { %v520_v17 = vpop.f32.mrf.mxu0  ;;  %v648_v18 = vpop.f32.mrf.mxu1 }
  0xf1   :  { %1090 = vst [vmem:[%s1775_s3 + $0x20] sm:$0xff] %v1026_v13  ;;  %1122 = vst [vmem:[%s1775_s3 + $0x120] sm:$0xff] %v1058_v14  ;;  %v1029_v19 = vmax.f32 %v965_v15, 0.0  ;;  %v1061_v20 = vmax.f32 %v997_v16, 0.0  ;;  %v963_v21 = vadd.f32 %v1514_v40, %v520_v17  ;;  %v995_v22 = vadd.f32 %v1514_v40, %v648_v18 }
  0xf2   :  { %v1261_v23 = vpop.f32.mrf.mxu0  ;;  %v1293_v24 = vpop.f32.mrf.mxu1 }
  0xf3   :  { %1093 = vst [vmem:[%s1775_s3 + $0x38] sm:$0xff] %v1029_v19  ;;  %1125 = vst [vmem:[%s1775_s3 + $0x138] sm:$0xff] %v1061_v20  ;;  %v1027_v25 = vmax.f32 %v963_v21, 0.0  ;;  %v1059_v26 = vmax.f32 %v995_v22, 0.0  ;;  %v968_v27 = vadd.f32 %v1261_v23, %v1514_v40  ;;  %v1000_v28 = vadd.f32 %v1293_v24, %v1514_v40 }
  0xf4   :  { %v533_v29 = vpop.f32.mrf.mxu0  ;;  %v661_v30 = vpop.f32.mrf.mxu1 }
  0xf5   :  { %1091 = vst [vmem:[%s1775_s3 + $0x28] sm:$0xff] %v1027_v25  ;;  %1123 = vst [vmem:[%s1775_s3 + $0x128] sm:$0xff] %v1059_v26  ;;  %v1032_v31 = vmax.f32 %v968_v27, 0.0  ;;  %v1064_v32 = vmax.f32 %v1000_v28, 0.0  ;;  %v966_v33 = vadd.f32 %v1514_v40, %v533_v29  ;;  %v998_v34 = vadd.f32 %v1514_v40, %v661_v30 }
  0xf6   :  { %v1262_v35 = vpop.f32.mrf.mxu0  ;;  %v1294_v36 = vpop.f32.mrf.mxu1 }
  0xf7   :  { %1096 = vst [vmem:[%s1775_s3 + $0x50] sm:$0xff] %v1032_v31  ;;  %1128 = vst [vmem:[%s1775_s3 + $0x150] sm:$0xff] %v1064_v32  ;;  %v1030_v37 = vmax.f32 %v966_v33, 0.0  ;;  %v1062_v38 = vmax.f32 %v998_v34, 0.0  ;;  %v969_v39 = vadd.f32 %v1262_v35, %v1514_v40  ;;  %v1001_v41 = vadd.f32 %v1294_v36, %v1514_v40 }
  0xf8   :  { %v536_v42 = vpop.f32.mrf.mxu0  ;;  %v664_v43 = vpop.f32.mrf.mxu1 }
  0xf9   :  { %1094 = vst [vmem:[%s1775_s3 + $0x40] sm:$0xff] %v1030_v37  ;;  %1126 = vst [vmem:[%s1775_s3 + $0x140] sm:$0xff] %v1062_v38  ;;  %v1033_v44 = vmax.f32 %v969_v39, 0.0  ;;  %v1065_v45 = vmax.f32 %v1001_v41, 0.0  ;;  %v967_v46 = vadd.f32 %v1514_v40, %v536_v42  ;;  %v999_v47 = vadd.f32 %v1514_v40, %v664_v43 }
  0xfa   :  { %v1265_v48 = vpop.f32.mrf.mxu0  ;;  %v1297_v49 = vpop.f32.mrf.mxu1 }
  0xfb   :  { %1097 = vst [vmem:[%s1775_s3 + $0x58] sm:$0xff] %v1033_v44  ;;  %1129 = vst [vmem:[%s1775_s3 + $0x158] sm:$0xff] %v1065_v45  ;;  %v1031_v50 = vmax.f32 %v967_v46, 0.0  ;;  %v1063_v51 = vmax.f32 %v999_v47, 0.0  ;;  %v972_v52 = vadd.f32 %v1265_v48, %v1514_v40  ;;  %v1004_v53 = vadd.f32 %v1297_v49, %v1514_v40 }
  0xfc   :  { %v549_v54 = vpop.f32.mrf.mxu0  ;;  %v677_v55 = vpop.f32.mrf.mxu1 }
  0xfd   :  { %1095 = vst [vmem:[%s1775_s3 + $0x48] sm:$0xff] %v1031_v50  ;;  %1127 = vst [vmem:[%s1775_s3 + $0x148] sm:$0xff] %v1063_v51  ;;  %v1036_v56 = vmax.f32 %v972_v52, 0.0  ;;  %v1068_v57 = vmax.f32 %v1004_v53, 0.0  ;;  %v970_v58 = vadd.f32 %v1514_v40, %v549_v54  ;;  %v1002_v59 = vadd.f32 %v1514_v40, %v677_v55 }
  0xfe   :  { %v1266_v60 = vpop.f32.mrf.mxu0  ;;  %v1298_v61 = vpop.f32.mrf.mxu1 }
  0xff   :  { %1100 = vst [vmem:[%s1775_s3 + $0x70] sm:$0xff] %v1036_v56  ;;  %1132 = vst [vmem:[%s1775_s3 + $0x170] sm:$0xff] %v1068_v57  ;;  %v1034_v62 = vmax.f32 %v970_v58, 0.0  ;;  %v1066_v63 = vmax.f32 %v1002_v59, 0.0  ;;  %v973_v0 = vadd.f32 %v1266_v60, %v1514_v40  ;;  %v1005_v1 = vadd.f32 %v1298_v61, %v1514_v40 }
 0x100   :  { %v552_v2 = vpop.f32.mrf.mxu0  ;;  %v680_v3 = vpop.f32.mrf.mxu1 }
 0x101   :  { %1098 = vst [vmem:[%s1775_s3 + $0x60] sm:$0xff] %v1034_v62  ;;  %1130 = vst [vmem:[%s1775_s3 + $0x160] sm:$0xff] %v1066_v63  ;;  %v1037_v4 = vmax.f32 %v973_v0, 0.0  ;;  %v1069_v5 = vmax.f32 %v1005_v1, 0.0  ;;  %v971_v6 = vadd.f32 %v1514_v40, %v552_v2  ;;  %v1003_v7 = vadd.f32 %v1514_v40, %v680_v3 }
 0x102   :  { %v1269_v8 = vpop.f32.mrf.mxu0  ;;  %v1301_v9 = vpop.f32.mrf.mxu1 }
 0x103   :  { %1101 = vst [vmem:[%s1775_s3 + $0x78] sm:$0xff] %v1037_v4  ;;  %1133 = vst [vmem:[%s1775_s3 + $0x178] sm:$0xff] %v1069_v5  ;;  %v1035_v10 = vmax.f32 %v971_v6, 0.0  ;;  %v1067_v11 = vmax.f32 %v1003_v7, 0.0  ;;  %v976_v12 = vadd.f32 %v1269_v8, %v1514_v40  ;;  %v1008_v13 = vadd.f32 %v1301_v9, %v1514_v40 }
 0x104   :  { %v565_v14 = vpop.f32.mrf.mxu0  ;;  %v693_v15 = vpop.f32.mrf.mxu1 }
 0x105   :  { %1099 = vst [vmem:[%s1775_s3 + $0x68] sm:$0xff] %v1035_v10  ;;  %1131 = vst [vmem:[%s1775_s3 + $0x168] sm:$0xff] %v1067_v11  ;;  %v1040_v16 = vmax.f32 %v976_v12, 0.0  ;;  %v1072_v17 = vmax.f32 %v1008_v13, 0.0  ;;  %v974_v18 = vadd.f32 %v1514_v40, %v565_v14  ;;  %v1006_v19 = vadd.f32 %v1514_v40, %v693_v15 }
 0x106   :  { %v1270_v20 = vpop.f32.mrf.mxu0  ;;  %v1302_v21 = vpop.f32.mrf.mxu1 }
 0x107   :  { %1104 = vst [vmem:[%s1775_s3 + $0x90] sm:$0xff] %v1040_v16  ;;  %1136 = vst [vmem:[%s1775_s3 + $0x190] sm:$0xff] %v1072_v17  ;;  %v1038_v22 = vmax.f32 %v974_v18, 0.0  ;;  %v1070_v23 = vmax.f32 %v1006_v19, 0.0  ;;  %v977_v24 = vadd.f32 %v1270_v20, %v1514_v40  ;;  %v1009_v25 = vadd.f32 %v1302_v21, %v1514_v40 }
 0x108   :  { %v568_v26 = vpop.f32.mrf.mxu0  ;;  %v696_v27 = vpop.f32.mrf.mxu1 }
 0x109   :  { %1102 = vst [vmem:[%s1775_s3 + $0x80] sm:$0xff] %v1038_v22  ;;  %1134 = vst [vmem:[%s1775_s3 + $0x180] sm:$0xff] %v1070_v23  ;;  %v1041_v28 = vmax.f32 %v977_v24, 0.0  ;;  %v1073_v29 = vmax.f32 %v1009_v25, 0.0  ;;  %v975_v30 = vadd.f32 %v1514_v40, %v568_v26  ;;  %v1007_v31 = vadd.f32 %v1514_v40, %v696_v27 }
 0x10a   :  { %v1273_v32 = vpop.f32.mrf.mxu0  ;;  %v1305_v33 = vpop.f32.mrf.mxu1 }
 0x10b   :  { %1105 = vst [vmem:[%s1775_s3 + $0x98] sm:$0xff] %v1041_v28  ;;  %1137 = vst [vmem:[%s1775_s3 + $0x198] sm:$0xff] %v1073_v29  ;;  %v1039_v34 = vmax.f32 %v975_v30, 0.0  ;;  %v1071_v35 = vmax.f32 %v1007_v31, 0.0  ;;  %v980_v36 = vadd.f32 %v1273_v32, %v1514_v40  ;;  %v1012_v37 = vadd.f32 %v1305_v33, %v1514_v40 }
 0x10c   :  { %v581_v38 = vpop.f32.mrf.mxu0  ;;  %v709_v39 = vpop.f32.mrf.mxu1 }
 0x10d   :  { %1103 = vst [vmem:[%s1775_s3 + $0x88] sm:$0xff] %v1039_v34  ;;  %1135 = vst [vmem:[%s1775_s3 + $0x188] sm:$0xff] %v1071_v35  ;;  %v1044_v41 = vmax.f32 %v980_v36, 0.0  ;;  %v1076_v42 = vmax.f32 %v1012_v37, 0.0  ;;  %v978_v43 = vadd.f32 %v1514_v40, %v581_v38  ;;  %v1010_v44 = vadd.f32 %v1514_v40, %v709_v39 }
 0x10e   :  { %v1274_v45 = vpop.f32.mrf.mxu0  ;;  %v1306_v46 = vpop.f32.mrf.mxu1 }
 0x10f   :  { %1108 = vst [vmem:[%s1775_s3 + $0xb0] sm:$0xff] %v1044_v41  ;;  %1140 = vst [vmem:[%s1775_s3 + $0x1b0] sm:$0xff] %v1076_v42  ;;  %v1042_v47 = vmax.f32 %v978_v43, 0.0  ;;  %v1074_v48 = vmax.f32 %v1010_v44, 0.0  ;;  %v981_v49 = vadd.f32 %v1274_v45, %v1514_v40  ;;  %v1013_v50 = vadd.f32 %v1306_v46, %v1514_v40 }
 0x110   :  { %v584_v51 = vpop.f32.mrf.mxu0  ;;  %v712_v52 = vpop.f32.mrf.mxu1 }
 0x111   :  { %1106 = vst [vmem:[%s1775_s3 + $0xa0] sm:$0xff] %v1042_v47  ;;  %1138 = vst [vmem:[%s1775_s3 + $0x1a0] sm:$0xff] %v1074_v48  ;;  %v1045_v53 = vmax.f32 %v981_v49, 0.0  ;;  %v1077_v54 = vmax.f32 %v1013_v50, 0.0  ;;  %v979_v55 = vadd.f32 %v1514_v40, %v584_v51  ;;  %v1011_v56 = vadd.f32 %v1514_v40, %v712_v52 }
 0x112   :  { %v1277_v57 = vpop.f32.mrf.mxu0  ;;  %v1309_v58 = vpop.f32.mrf.mxu1 }
 0x113   :  { %1109 = vst [vmem:[%s1775_s3 + $0xb8] sm:$0xff] %v1045_v53  ;;  %1141 = vst [vmem:[%s1775_s3 + $0x1b8] sm:$0xff] %v1077_v54  ;;  %v1043_v59 = vmax.f32 %v979_v55, 0.0  ;;  %v1075_v60 = vmax.f32 %v1011_v56, 0.0  ;;  %v984_v61 = vadd.f32 %v1277_v57, %v1514_v40  ;;  %v1016_v62 = vadd.f32 %v1309_v58, %v1514_v40 }
 0x114   :  { %v597_v63 = vpop.f32.mrf.mxu0  ;;  %v725_v0 = vpop.f32.mrf.mxu1 }
 0x115   :  { %1107 = vst [vmem:[%s1775_s3 + $0xa8] sm:$0xff] %v1043_v59  ;;  %1139 = vst [vmem:[%s1775_s3 + $0x1a8] sm:$0xff] %v1075_v60  ;;  %v1048_v1 = vmax.f32 %v984_v61, 0.0  ;;  %v1080_v2 = vmax.f32 %v1016_v62, 0.0  ;;  %v982_v3 = vadd.f32 %v1514_v40, %v597_v63  ;;  %v1014_v4 = vadd.f32 %v1514_v40, %v725_v0 }
 0x116   :  { %v1278_v5 = vpop.f32.mrf.mxu0  ;;  %v1310_v6 = vpop.f32.mrf.mxu1 }
 0x117   :  { %1112 = vst [vmem:[%s1775_s3 + $0xd0] sm:$0xff] %v1048_v1  ;;  %1144 = vst [vmem:[%s1775_s3 + $0x1d0] sm:$0xff] %v1080_v2  ;;  %v1046_v7 = vmax.f32 %v982_v3, 0.0  ;;  %v1078_v8 = vmax.f32 %v1014_v4, 0.0  ;;  %v985_v9 = vadd.f32 %v1278_v5, %v1514_v40  ;;  %v1017_v10 = vadd.f32 %v1310_v6, %v1514_v40 }
 0x118   :  { %v600_v11 = vpop.f32.mrf.mxu0  ;;  %v728_v12 = vpop.f32.mrf.mxu1 }
 0x119   :  { %1110 = vst [vmem:[%s1775_s3 + $0xc0] sm:$0xff] %v1046_v7  ;;  %1142 = vst [vmem:[%s1775_s3 + $0x1c0] sm:$0xff] %v1078_v8  ;;  %v1049_v13 = vmax.f32 %v985_v9, 0.0  ;;  %v1081_v14 = vmax.f32 %v1017_v10, 0.0  ;;  %v983_v15 = vadd.f32 %v1514_v40, %v600_v11  ;;  %v1015_v16 = vadd.f32 %v1514_v40, %v728_v12 }
 0x11a   :  { %v1281_v17 = vpop.f32.mrf.mxu0  ;;  %v1313_v18 = vpop.f32.mrf.mxu1 }
 0x11b   :  { %1113 = vst [vmem:[%s1775_s3 + $0xd8] sm:$0xff] %v1049_v13  ;;  %1145 = vst [vmem:[%s1775_s3 + $0x1d8] sm:$0xff] %v1081_v14  ;;  %v1047_v19 = vmax.f32 %v983_v15, 0.0  ;;  %v1079_v20 = vmax.f32 %v1015_v16, 0.0  ;;  %v988_v21 = vadd.f32 %v1281_v17, %v1514_v40  ;;  %v1020_v22 = vadd.f32 %v1313_v18, %v1514_v40 }
 0x11c   :  { %v613_v23 = vpop.f32.mrf.mxu0  ;;  %v741_v24 = vpop.f32.mrf.mxu1 }
 0x11d   :  { %1111 = vst [vmem:[%s1775_s3 + $0xc8] sm:$0xff] %v1047_v19  ;;  %1143 = vst [vmem:[%s1775_s3 + $0x1c8] sm:$0xff] %v1079_v20  ;;  %v1052_v25 = vmax.f32 %v988_v21, 0.0  ;;  %v1084_v26 = vmax.f32 %v1020_v22, 0.0  ;;  %v986_v27 = vadd.f32 %v1514_v40, %v613_v23  ;;  %v1018_v28 = vadd.f32 %v1514_v40, %v741_v24 }
 0x11e   :  { %v1282_v29 = vpop.f32.mrf.mxu0  ;;  %v1314_v30 = vpop.f32.mrf.mxu1 }
 0x11f   :  { %1116 = vst [vmem:[%s1775_s3 + $0xf0] sm:$0xff] %v1052_v25  ;;  %1148 = vst [vmem:[%s1775_s3 + $0x1f0] sm:$0xff] %v1084_v26  ;;  %v1050_v31 = vmax.f32 %v986_v27, 0.0  ;;  %v1082_v32 = vmax.f32 %v1018_v28, 0.0  ;;  %v989_v33 = vadd.f32 %v1282_v29, %v1514_v40  ;;  %v1021_v34 = vadd.f32 %v1314_v30, %v1514_v40 }
 0x120   :  { %v616_v35 = vpop.f32.mrf.mxu0  ;;  %v744_v36 = vpop.f32.mrf.mxu1 }
 0x121   :  { %1114 = vst [vmem:[%s1775_s3 + $0xe0] sm:$0xff] %v1050_v31  ;;  %1146 = vst [vmem:[%s1775_s3 + $0x1e0] sm:$0xff] %v1082_v32  ;;  %v1053_v37 = vmax.f32 %v989_v33, 0.0  ;;  %v1085_v38 = vmax.f32 %v1021_v34, 0.0  ;;  %v987_v39 = vadd.f32 %v1514_v40, %v616_v35  ;;  %v1019_v41 = vadd.f32 %v1514_v40, %v744_v36 }
 0x123   :  { %1117 = vst [vmem:[%s1775_s3 + $0xf8] sm:$0xff] %v1053_v37  ;;  %1149 = vst [vmem:[%s1775_s3 + $0x1f8] sm:$0xff] %v1085_v38  ;;  %v1051_v42 = vmax.f32 %v987_v39, 0.0  ;;  %v1083_v43 = vmax.f32 %v1019_v41, 0.0 }
 0x125   :  { %1115 = vst [vmem:[%s1775_s3 + $0xe8] sm:$0xff] %v1051_v42  ;;  %1147 = vst [vmem:[%s1775_s3 + $0x1e8] sm:$0xff] %v1083_v43 }

// kernel: a_call__.6
= control target key start
LH: loop header
LB: loop body
LE: loop exit
PB: predicated region body
PF: predicated region fallthrough
CT: control target
= control target key end

     0   :  { %vm54_vm0 = vcmask 1041409   ;;  %s123_s0 = inlined_call_operand.vmem [shape: f32[2,64,128], index: 0, kind: input, shape index: {}]   ;;  %s124_s1 = inlined_call_operand.vmem [shape: f32[2,128], index: 1, kind: output, shape index: {}]  }
   0x1   :  { %v8_v0 = vld [vmem:[%s123_s0] sm:$0xff]  ;;  %v9_v1 = vld [vmem:[%s123_s0 + $0x8] sm:$0xff]  ;;  %v10_v2 = vld [vmem:[%s123_s0 + $0x10] sm:$0xff] }
   0x2   :  { %v24_v3 = vadd.f32 %v9_v1, %v8_v0  ;;  %v11_v4 = vld [vmem:[%s123_s0 + $0x18] sm:$0xff]  ;;  %v16_v5 = vld [vmem:[%s123_s0 + $0x40] sm:$0xff]  ;;  %v17_v6 = vld [vmem:[%s123_s0 + $0x48] sm:$0xff] }
   0x3   :  { %v18_v7 = vld [vmem:[%s123_s0 + $0x50] sm:$0xff]  ;;  %v12_v9 = vld [vmem:[%s123_s0 + $0x20] sm:$0xff]  ;;  %v37_v10 = vadd.f32 %v17_v6, %v16_v5  ;;  %v19_v11 = vld [vmem:[%s123_s0 + $0x58] sm:$0xff] }
   0x4   :  { %v25_v8 = vadd.f32 %v24_v3, %v10_v2  ;;  %v13_v13 = vld [vmem:[%s123_s0 + $0x28] sm:$0xff]  ;;  %v20_v15 = vld [vmem:[%s123_s0 + $0x60] sm:$0xff]  ;;  %v14_v17 = vld [vmem:[%s123_s0 + $0x30] sm:$0xff] }
   0x5   :  { %v38_v14 = vadd.f32 %v37_v10, %v18_v7  ;;  %v21_v19 = vld [vmem:[%s123_s0 + $0x68] sm:$0xff]  ;;  %v15_v21 = vld [vmem:[%s123_s0 + $0x38] sm:$0xff]  ;;  %v22_v23 = vld [vmem:[%s123_s0 + $0x70] sm:$0xff] }
   0x6   :  { %v26_v12 = vadd.f32 %v25_v8, %v11_v4  ;;  %v23_v26 = vld [vmem:[%s123_s0 + $0x78] sm:$0xff] }
   0x7   :  { %v39_v18 = vadd.f32 %v38_v14, %v19_v11 }
   0x8   :  { %v27_v16 = vadd.f32 %v26_v12, %v12_v9 }
   0x9   :  { %v40_v22 = vadd.f32 %v39_v18, %v20_v15 }
   0xa   :  { %v28_v20 = vadd.f32 %v27_v16, %v13_v13 }
   0xb   :  { %v41_v25 = vadd.f32 %v40_v22, %v21_v19 }
   0xc   :  { %v29_v24 = vadd.f32 %v28_v20, %v14_v17 }
   0xd   :  { %v42_v28 = vadd.f32 %v41_v25, %v22_v23 }
   0xe   :  { %v30_v27 = vadd.f32 %v29_v24, %v15_v21 }
   0xf   :  { %v43_v30 = vadd.f32 %v42_v28, %v23_v26 }
  0x10   :  { %v31_v29 = vrot.slane %v30_v27, 4 }
  0x11   :  { %v44_v32 = vrot.slane %v43_v30, 4 }
  0x12   :  { %v32_v31 = vadd.f32 %v31_v29, %v30_v27 }
  0x13   :  { %v45_v34 = vadd.f32 %v44_v32, %v43_v30 }
  0x14   :  { %v33_v33 = vrot.slane %v32_v31, 2 }
  0x15   :  { %v46_v36 = vrot.slane %v45_v34, 2 }
  0x16   :  { %v34_v35 = vadd.f32 %v33_v33, %v32_v31 }
  0x17   :  { %v47_v38 = vadd.f32 %v46_v36, %v45_v34 }
  0x18   :  { %v35_v37 = vrot.slane %v34_v35, 1 }
  0x19   :  { %v48_v40 = vrot.slane %v47_v38, 1 }
  0x1a   :  { %v36_v39 = vadd.f32 %v35_v37, %v34_v35 }
  0x1b   :  { %v49_v41 = vadd.f32 %v48_v40, %v47_v38 }
  0x1c   :  { %v50_v42 = vmul.f32 0.015625, %v36_v39 }
  0x1d   :  { %v51_v43 = vmul.f32 0.015625, %v49_v41 }
  0x1f   :  { %v55_v44 = vsel %vm54_vm0, %v51_v43, %v50_v42 }
  0x20   :  { %57 = vst [vmem:[%s124_s1] sm:$0x3] %v55_v44 }

// kernel: a_call__.5
= control target key start
LH: loop header
LB: loop body
LE: loop exit
PB: predicated region body
PF: predicated region fallthrough
CT: control target
= control target key end

     0   :  { %s602_s1 = inlined_call_operand.vmem [shape: bf16[128,128], index: 1, kind: input, shape index: {}]   ;;  %s603_s0 = inlined_call_operand.vmem [shape: bf16[128,128], index: 0, kind: input, shape index: {}]   ;;  %s604_s2 = inlined_call_operand.vmem [shape: f32[1,128], index: 2, kind: input, shape index: {}]   ;;  %s605_s3 = inlined_call_operand.vmem [shape: f32[128,128], index: 3, kind: output, shape index: {}]  }
   0x1   :  { %v467_v0 = vld [vmem:[%s602_s1 + $0x38] sm:$0xff]   ;;  %v468_v1 = vld [vmem:[%s602_s1 + $0x30] sm:$0xff]   ;;  %v469_v2 = vld [vmem:[%s602_s1 + $0x28] sm:$0xff]  }
   0x2   :  { %419 = vmatprep.subr.bf16.mxu0 %v467_v0  ;;  %451 = vmatprep.subr.bf16.mxu1 %v467_v0  ;;  %v470_v3 = vld [vmem:[%s602_s1 + $0x20] sm:$0xff]   ;;  %v471_v6 = vld [vmem:[%s602_s1 + $0x18] sm:$0xff]   ;;  %v472_v7 = vld [vmem:[%s602_s1 + $0x10] sm:$0xff]  }
   0x3   :  { %420 = vmatpush3.bf16.msra.mxu0 %v467_v0  ;;  %459 = vmatpush3.bf16.msra.mxu1 %v467_v0  ;;  %v475_v4 = vld [vmem:[%s603_s0] sm:$0xff]   ;;  %v473_v8 = vld [vmem:[%s602_s1 + $0x8] sm:$0xff]   ;;  %v479_v12 = vld [vmem:[%s603_s0 + $0x10] sm:$0xff]  }
   0x4   :  { %421 = vmatprep.subr.bf16.mxu0 %v468_v1  ;;  %452 = vmatprep.subr.bf16.mxu1 %v468_v1  ;;  %v476_v5 = vld [vmem:[%s603_s0 + $0x20] sm:$0xff]   ;;  %v477_v10 = vld [vmem:[%s603_s0 + $0x8] sm:$0xff]   ;;  %v480_v13 = vld [vmem:[%s603_s0 + $0x30] sm:$0xff]  }
   0x5   :  { %435 = vmatprep.mubr.bf16.mxu0 %v475_v4  ;;  %443 = vmatprep.mubr.bf16.mxu1 %v476_v5  ;;  %v474_v9 = vld [vmem:[%s602_s1] sm:$0xff]   ;;  %v478_v11 = vld [vmem:[%s603_s0 + $0x28] sm:$0xff]   ;;  %v481_v14 = vld [vmem:[%s603_s0 + $0x18] sm:$0xff]  }
   0x6   :  { %v482_v15 = vld [vmem:[%s603_s0 + $0x38] sm:$0xff]   ;;  %v402_v16 = vld [vmem:[%s604_s2] ss:$0 sm:$0xff] }
   0x7   :  { %422 = vmatpush3.bf16.msra.mxu0 %v468_v1  ;;  %460 = vmatpush3.bf16.msra.mxu1 %v468_v1 }
   0x8   :  { %423 = vmatprep.subr.bf16.mxu0 %v469_v2  ;;  %453 = vmatprep.subr.bf16.mxu1 %v469_v2 }
   0xb   :  { %424 = vmatpush3.bf16.msra.mxu0 %v469_v2  ;;  %461 = vmatpush3.bf16.msra.mxu1 %v469_v2 }
   0xc   :  { %425 = vmatprep.subr.bf16.mxu0 %v470_v3  ;;  %454 = vmatprep.subr.bf16.mxu1 %v470_v3 }
   0xf   :  { %426 = vmatpush3.bf16.msra.mxu0 %v470_v3  ;;  %462 = vmatpush3.bf16.msra.mxu1 %v470_v3 }
  0x10   :  { %427 = vmatprep.subr.bf16.mxu0 %v471_v6  ;;  %455 = vmatprep.subr.bf16.mxu1 %v471_v6 }
  0x13   :  { %428 = vmatpush3.bf16.msra.mxu0 %v471_v6  ;;  %463 = vmatpush3.bf16.msra.mxu1 %v471_v6 }
  0x14   :  { %429 = vmatprep.subr.bf16.mxu0 %v472_v7  ;;  %456 = vmatprep.subr.bf16.mxu1 %v472_v7 }
  0x17   :  { %430 = vmatpush3.bf16.msra.mxu0 %v472_v7  ;;  %464 = vmatpush3.bf16.msra.mxu1 %v472_v7 }
  0x18   :  { %431 = vmatprep.subr.bf16.mxu0 %v473_v8  ;;  %457 = vmatprep.subr.bf16.mxu1 %v473_v8 }
  0x1b   :  { %432 = vmatpush3.bf16.msra.mxu0 %v473_v8  ;;  %465 = vmatpush3.bf16.msra.mxu1 %v473_v8 }
  0x1c   :  { %433 = vmatprep.subr.bf16.mxu0 %v474_v9  ;;  %458 = vmatprep.subr.bf16.mxu1 %v474_v9 }
  0x1f   :  { %434 = vmatpush3.bf16.msra.mxu0 %v474_v9  ;;  %466 = vmatpush3.bf16.msra.mxu1 %v474_v9 }
  0x22   :  { %436 = vmatmul.mubr.bf16.vlgmr.msra.gmra.mxu0 %v477_v10  ;;  %444 = vmatmul.mubr.bf16.vlgmr.msra.gmra.mxu1 %v478_v11 }
  0x23   :  { %439 = vmatprep.mubr.bf16.mxu0 %v479_v12  ;;  %447 = vmatprep.mubr.bf16.mxu1 %v480_v13 }
  0x2a   :  { %440 = vmatmul.mubr.bf16.gmra.mxu0 %v481_v14  ;;  %448 = vmatmul.mubr.bf16.gmra.mxu1 %v482_v15 }
  0xe2   :  { %v437_v17 = vpop.f32.mrf.mxu0  ;;  %v445_v18 = vpop.f32.mrf.mxu1 }
  0xe3   :  { %v336_v19 = vadd.f32 %v437_v17, %v402_v16  ;;  %v344_v20 = vadd.f32 %v445_v18, %v402_v16 }
  0xe4   :  { %v213_v21 = vpop.f32.mrf.mxu0  ;;  %v245_v22 = vpop.f32.mrf.mxu1 }
  0xe5   :  { %v352_v23 = vmax.f32 %v336_v19, 0.0  ;;  %v360_v24 = vmax.f32 %v344_v20, 0.0  ;;  %v334_v25 = vadd.f32 %v402_v16, %v213_v21  ;;  %v342_v26 = vadd.f32 %v402_v16, %v245_v22 }
  0xe6   :  { %v438_v27 = vpop.f32.mrf.mxu0  ;;  %v446_v28 = vpop.f32.mrf.mxu1 }
  0xe7   :  { %368 = vst [vmem:[%s605_s3 + $0x10] sm:$0xff] %v352_v23  ;;  %376 = vst [vmem:[%s605_s3 + $0x50] sm:$0xff] %v360_v24  ;;  %v350_v29 = vmax.f32 %v334_v25, 0.0  ;;  %v358_v30 = vmax.f32 %v342_v26, 0.0  ;;  %v337_v31 = vadd.f32 %v438_v27, %v402_v16  ;;  %v345_v32 = vadd.f32 %v446_v28, %v402_v16 }
  0xe8   :  { %v216_v33 = vpop.f32.mrf.mxu0  ;;  %v248_v34 = vpop.f32.mrf.mxu1 }
  0xe9   :  { %366 = vst [vmem:[%s605_s3] sm:$0xff] %v350_v29  ;;  %374 = vst [vmem:[%s605_s3 + $0x40] sm:$0xff] %v358_v30  ;;  %v353_v35 = vmax.f32 %v337_v31, 0.0  ;;  %v361_v36 = vmax.f32 %v345_v32, 0.0  ;;  %v335_v37 = vadd.f32 %v402_v16, %v216_v33  ;;  %v343_v38 = vadd.f32 %v402_v16, %v248_v34 }
  0xea   :  { %v441_v39 = vpop.f32.mrf.mxu0  ;;  %v449_v40 = vpop.f32.mrf.mxu1 }
  0xeb   :  { %369 = vst [vmem:[%s605_s3 + $0x18] sm:$0xff] %v353_v35  ;;  %377 = vst [vmem:[%s605_s3 + $0x58] sm:$0xff] %v361_v36  ;;  %v351_v41 = vmax.f32 %v335_v37, 0.0  ;;  %v359_v42 = vmax.f32 %v343_v38, 0.0  ;;  %v340_v43 = vadd.f32 %v441_v39, %v402_v16  ;;  %v348_v44 = vadd.f32 %v449_v40, %v402_v16 }
  0xec   :  { %v229_v45 = vpop.f32.mrf.mxu0  ;;  %v261_v46 = vpop.f32.mrf.mxu1 }
  0xed   :  { %367 = vst [vmem:[%s605_s3 + $0x8] sm:$0xff] %v351_v41  ;;  %375 = vst [vmem:[%s605_s3 + $0x48] sm:$0xff] %v359_v42  ;;  %v356_v47 = vmax.f32 %v340_v43, 0.0  ;;  %v364_v48 = vmax.f32 %v348_v44, 0.0  ;;  %v338_v49 = vadd.f32 %v402_v16, %v229_v45  ;;  %v346_v50 = vadd.f32 %v402_v16, %v261_v46 }
  0xee   :  { %v442_v51 = vpop.f32.mrf.mxu0  ;;  %v450_v52 = vpop.f32.mrf.mxu1 }
  0xef   :  { %372 = vst [vmem:[%s605_s3 + $0x30] sm:$0xff] %v356_v47  ;;  %380 = vst [vmem:[%s605_s3 + $0x70] sm:$0xff] %v364_v48  ;;  %v354_v53 = vmax.f32 %v338_v49, 0.0  ;;  %v362_v54 = vmax.f32 %v346_v50, 0.0  ;;  %v341_v55 = vadd.f32 %v442_v51, %v402_v16  ;;  %v349_v56 = vadd.f32 %v450_v52, %v402_v16 }
  0xf0   :  { %v232_v57 = vpop.f32.mrf.mxu0  ;;  %v264_v58 = vpop.f32.mrf.mxu1 }
  0xf1   :  { %370 = vst [vmem:[%s605_s3 + $0x20] sm:$0xff] %v354_v53  ;;  %378 = vst [vmem:[%s605_s3 + $0x60] sm:$0xff] %v362_v54  ;;  %v357_v59 = vmax.f32 %v341_v55, 0.0  ;;  %v365_v60 = vmax.f32 %v349_v56, 0.0  ;;  %v339_v61 = vadd.f32 %v402_v16, %v232_v57  ;;  %v347_v62 = vadd.f32 %v402_v16, %v264_v58 }
  0xf3   :  { %373 = vst [vmem:[%s605_s3 + $0x38] sm:$0xff] %v357_v59  ;;  %381 = vst [vmem:[%s605_s3 + $0x78] sm:$0xff] %v365_v60  ;;  %v355_v63 = vmax.f32 %v339_v61, 0.0  ;;  %v363_v0 = vmax.f32 %v347_v62, 0.0 }
  0xf5   :  { %371 = vst [vmem:[%s605_s3 + $0x28] sm:$0xff] %v355_v63  ;;  %379 = vst [vmem:[%s605_s3 + $0x68] sm:$0xff] %v363_v0 }

// kernel: a_call__.7
= control target key start
LH: loop header
LB: loop body
LE: loop exit
PB: predicated region body
PF: predicated region fallthrough
CT: control target
= control target key end

     0   :  { %v358_v0 = vmov 0.0   ;;  %vm359_vm0 = vmmov 0   ;;  %s453_s1 = inlined_call_operand.vmem [shape: bf16[128,128], index: 1, kind: input, shape index: {}]   ;;  %s454_s3 = inlined_call_operand.vmem [shape: bf16[128,128], index: 3, kind: input, shape index: {}]   ;;  %s455_s0 = inlined_call_operand.vmem [shape: bf16[16,128], index: 0, kind: input, shape index: {}]   ;;  %s456_s2 = inlined_call_operand.vmem [shape: f32[1,128], index: 2, kind: input, shape index: {}]   ;;  %s457_s4 = inlined_call_operand.vmem [shape: f32[1,128], index: 4, kind: input, shape index: {}]   ;;  %s458_s5 = inlined_call_operand.vmem [shape: f32[16,128], index: 5, kind: output, shape index: {}]  }
   0x1   :  { %299 = vmatprep.subr.bf16.mxu0 %v358_v0  ;;  %v341_v1 = vld [vmem:[%s453_s1 + $0x38] sm:$0xff]   ;;  %315 = vmatprep.mubr.msk.bf16.mxu0 %vm359_vm0, %v358_v0  ;;  %v342_v2 = vld [vmem:[%s453_s1 + $0x30] sm:$0xff]   ;;  %v343_v3 = vld [vmem:[%s453_s1 + $0x28] sm:$0xff]  }
   0x2   :  { %319 = vmatprep.subr.bf16.mxu1 %v358_v0  ;;  %335 = vmatprep.mubr.msk.bf16.mxu1 %vm359_vm0, %v358_v0  ;;  %v350_v4 = vld [vmem:[%s454_s3 + $0x38] sm:$0xff]   ;;  %v344_v5 = vld [vmem:[%s453_s1 + $0x20] sm:$0xff]   ;;  %v351_v6 = vld [vmem:[%s454_s3 + $0x30] sm:$0xff]  }
   0x3   :  { %300 = vmatpush3.bf16.msra.mxu0 %v341_v1  ;;  %320 = vmatpush3.bf16.msra.mxu1 %v350_v4  ;;  %v345_v7 = vld [vmem:[%s453_s1 + $0x18] sm:$0xff]   ;;  %v352_v8 = vld [vmem:[%s454_s3 + $0x28] sm:$0xff]   ;;  %v346_v9 = vld [vmem:[%s453_s1 + $0x10] sm:$0xff]  }
   0x4   :  { %301 = vmatprep.subr.bf16.mxu0 %v358_v0  ;;  %321 = vmatprep.subr.bf16.mxu1 %v358_v0  ;;  %v353_v10 = vld [vmem:[%s454_s3 + $0x20] sm:$0xff]   ;;  %v347_v11 = vld [vmem:[%s453_s1 + $0x8] sm:$0xff]   ;;  %v354_v12 = vld [vmem:[%s454_s3 + $0x18] sm:$0xff]  }
   0x5   :  { %v348_v13 = vld [vmem:[%s453_s1] sm:$0xff]   ;;  %v355_v15 = vld [vmem:[%s454_s3 + $0x10] sm:$0xff]   ;;  %v356_v16 = vld [vmem:[%s454_s3 + $0x8] sm:$0xff]  }
   0x6   :  { %v349_v14 = vld [vmem:[%s455_s0] sm:$0xff]  }
   0x7   :  { %302 = vmatpush3.bf16.msra.mxu0 %v342_v2  ;;  %322 = vmatpush3.bf16.msra.mxu1 %v351_v6  ;;  %v357_v17 = vld [vmem:[%s454_s3] sm:$0xff]  }
   0x8   :  { %303 = vmatprep.subr.bf16.mxu0 %v358_v0  ;;  %323 = vmatprep.subr.bf16.mxu1 %v358_v0  ;;  %v262_v18 = vld [vmem:[%s456_s2] ss:$0 sm:$0xff] }
   0x9   :  { %v272_v28 = vld [vmem:[%s457_s4] ss:$0 sm:$0xff] }
   0xb   :  { %304 = vmatpush3.bf16.msra.mxu0 %v343_v3  ;;  %324 = vmatpush3.bf16.msra.mxu1 %v352_v8 }
   0xc   :  { %305 = vmatprep.subr.bf16.mxu0 %v358_v0  ;;  %325 = vmatprep.subr.bf16.mxu1 %v358_v0 }
   0xf   :  { %306 = vmatpush3.bf16.msra.mxu0 %v344_v5  ;;  %326 = vmatpush3.bf16.msra.mxu1 %v353_v10 }
  0x10   :  { %307 = vmatprep.subr.bf16.mxu0 %v358_v0  ;;  %327 = vmatprep.subr.bf16.mxu1 %v358_v0 }
  0x13   :  { %308 = vmatpush3.bf16.msra.mxu0 %v345_v7  ;;  %328 = vmatpush3.bf16.msra.mxu1 %v354_v12 }
  0x14   :  { %309 = vmatprep.subr.bf16.mxu0 %v358_v0  ;;  %329 = vmatprep.subr.bf16.mxu1 %v358_v0 }
  0x17   :  { %310 = vmatpush3.bf16.msra.mxu0 %v346_v9  ;;  %330 = vmatpush3.bf16.msra.mxu1 %v355_v15 }
  0x18   :  { %311 = vmatprep.subr.bf16.mxu0 %v358_v0  ;;  %331 = vmatprep.subr.bf16.mxu1 %v358_v0 }
  0x1b   :  { %312 = vmatpush3.bf16.msra.mxu0 %v347_v11  ;;  %332 = vmatpush3.bf16.msra.mxu1 %v356_v16 }
  0x1c   :  { %313 = vmatprep.subr.bf16.mxu0 %v358_v0  ;;  %333 = vmatprep.subr.bf16.mxu1 %v358_v0 }
  0x1f   :  { %314 = vmatpush3.bf16.msra.mxu0 %v348_v13  ;;  %334 = vmatpush3.bf16.msra.mxu1 %v357_v17 }
  0x22   :  { %316 = vmatmul.mubr.bf16.vlgmr.msra.gmra.mxu0 %v349_v14 }
  0xe2   :  { %v134_v19 = vpop.f32.mrf.mxu0 }
  0xe3   :  { %v135_v21 = vadd.f32 %v262_v18, %v134_v19 }
  0xe4   :  { %v317_v20 = vpop.f32.mrf.mxu0 }
  0xe5   :  { %v141_v25 = vmax.f32 %v135_v21, 0.0 }
  0xe6   :  { %v137_v22 = vpop.f32.mrf.mxu0 }
  0xe7   :  { %v138_v23 = vadd.f32 %v262_v18, %v137_v22 }
  0xe8   :  { %v318_v24 = vpop.f32.mrf.mxu0 }
  0xe9   :  { %v142_v26 = vmax.f32 %v138_v23, 0.0 }
  0xeb   :  { %v143_v27 = vpack.c.bf16 %v142_v26, %v141_v25 }
  0xed   :  { %336 = vmatmul.mubr.bf16.vlgmr.msra.gmra.mxu1 %v143_v27 }
 0x1ad   :  { %v249_v29 = vpop.f32.mrf.mxu1 }
 0x1ae   :  { %v250_v30 = vadd.f32 %v272_v28, %v249_v29 }
 0x1af   :  { %v337_v31 = vpop.f32.mrf.mxu1 }
 0x1b0   :  { %256 = vst [vmem:[%s458_s5] sm:$0xff] %v250_v30 }
 0x1b1   :  { %v252_v32 = vpop.f32.mrf.mxu1 }
 0x1b2   :  { %v253_v33 = vadd.f32 %v272_v28, %v252_v32 }
 0x1b3   :  { %v338_v34 = vpop.f32.mrf.mxu1 }
 0x1b4   :  { %257 = vst [vmem:[%s458_s5 + $0x8] sm:$0xff] %v253_v33 }

</bundles_post_ra>
